<compile_context>
chip_gen: v7x
topology: tpu7x:2x2x1
jax: 0.10.0
libtpu: 0.0.40
codegen_flags: <defaults>
</compile_context>

<pallas_src>
import functools

import jax
import jax.numpy as jnp
from jax.experimental import pallas as pl
from jax.experimental.pallas import tpu as pltpu


# ----------------------------------------------------------------------------
# Pallas kernel: patch projection (GEMM + bias) with optional fused LayerNorm
# ----------------------------------------------------------------------------
def _patch_embed_kernel(x_ref, w_ref, b_ref, g_ref, beta_ref, o_ref,
                        *, use_norm, eps):
    # (TM, K) @ (K, E) on the MXU, f32 accumulation.
    y = jnp.dot(x_ref[...], w_ref[...], preferred_element_type=jnp.float32)
    y = y + b_ref[...]                               # (1, E) broadcast

    if use_norm:                                     # LayerNorm over E per row
        mean = jnp.mean(y, axis=-1, keepdims=True)   # XLU cross-lane reduce
        cent = y - mean
        var = jnp.mean(cent * cent, axis=-1, keepdims=True)
        y = cent * jax.lax.rsqrt(var + eps)          # EUP
        y = y * g_ref[...] + beta_ref[...]

    o_ref[...] = y.astype(o_ref.dtype)


def patch_embed_matmul_pallas(patches, w_ke, bias, gamma, beta,
                              *, use_norm, eps=1e-5, tm=None):
    """patches: (M, K) f32;  w_ke: (K, E);  bias/gamma/beta: (1, E).

    Returns (M, E) f32 = LayerNorm(patches @ w_ke + bias) (norm optional).
    """
    M, K = patches.shape
    E = w_ke.shape[1]

    # Adaptive token-tile: big tiles for big M (fewer grid steps), small tiles
    # for small M (less padding).  VMEM use is tiny either way.
    if tm is None:
        tm = 512 if M >= 2048 else (256 if M >= 512 else 128)

    m_pad = pl.cdiv(M, tm) * tm
    if m_pad != M:
        patches = jnp.pad(patches, ((0, m_pad - M), (0, 0)))

    kernel = functools.partial(_patch_embed_kernel, use_norm=use_norm, eps=eps)
    out = pl.pallas_call(
        kernel,
        out_shape=jax.ShapeDtypeStruct((m_pad, E), jnp.float32),
        grid_spec=pltpu.PrefetchScalarGridSpec(
            num_scalar_prefetch=0,
            grid=(m_pad // tm,),
            in_specs=[
                # tokens: TM rows per grid step -> big GEMM M dimension
                pl.BlockSpec((tm, K), lambda i: (i, 0)),
                # grid-invariant weight / bias / norm params (stay in VMEM)
                pl.BlockSpec((K, E), lambda i: (0, 0)),
                pl.BlockSpec((1, E), lambda i: (0, 0)),
                pl.BlockSpec((1, E), lambda i: (0, 0)),
                pl.BlockSpec((1, E), lambda i: (0, 0)),
            ],
            out_specs=pl.BlockSpec((tm, E), lambda i: (i, 0)),
        ),
        compiler_params=pltpu.CompilerParams(
            dimension_semantics=("parallel",)),   # rows independent
    )(patches, w_ke, bias, gamma, beta)
    return out[:M]


# ----------------------------------------------------------------------------
# Full module forward (host-side patchify glue + Pallas GEMM kernel)
# ----------------------------------------------------------------------------
def patch_embed_forward(x, params, *, patch_size, embed_dim, use_norm):
    """x: (B, C_in, S, H, W) -> (B, embed_dim, Ws, Wh, Ww)  (PyTorch layout)."""
    B, c_in, S, H, W = x.shape
    p0, p1, p2 = patch_size

    # end-padding exactly like the PyTorch F.pad calls
    pad_w = (p2 - W % p2) % p2
    pad_h = (p1 - H % p1) % p1
    pad_s = (p0 - S % p0) % p0
    if pad_w or pad_h or pad_s:
        x = jnp.pad(x, ((0, 0), (0, 0), (0, pad_s), (0, pad_h), (0, pad_w)))
    _, _, Sp, Hp, Wp = x.shape
    Ws, Wh, Ww = Sp // p0, Hp // p1, Wp // p2

    # unfold non-overlapping patches; flatten order (C_in, p0, p1, p2) matches
    # Conv3d weight layout (E, C_in, p0, p1, p2)
    # TODO(synk): this patchify reshape/transpose (and the output transpose)
    # stays in plain JAX/XLA; folding the strided patch gather into the kernel
    # would need Element-indexed blocks with sub-(8,128) sublane tiles.
    xp = x.reshape(B, c_in, Ws, p0, Wh, p1, Ww, p2)
    xp = jnp.transpose(xp, (0, 2, 4, 6, 1, 3, 5, 7))
    K = c_in * p0 * p1 * p2
    patches = xp.reshape(B * Ws * Wh * Ww, K)

    w_ke = params["proj_w"].reshape(embed_dim, K).T            # (K, E)
    y = patch_embed_matmul_pallas(
        patches, w_ke,
        params["proj_b"][None, :],
        params["norm_g"][None, :],
        params["norm_b"][None, :],
        use_norm=use_norm)

    y = y.reshape(B, Ws, Wh, Ww, embed_dim)
    return jnp.transpose(y, (0, 4, 1, 2, 3))                   # (B, E, Ws, Wh, Ww)


# ----------------------------------------------------------------------------
# Pure-JAX reference (independent path: lax conv) for a correctness check
# ----------------------------------------------------------------------------
def patch_embed_reference(x, params, *, patch_size, embed_dim, use_norm,
                          eps=1e-5):
    p0, p1, p2 = patch_size
    B, c_in, S, H, W = x.shape
    pad_w = (p2 - W % p2) % p2
    pad_h = (p1 - H % p1) % p1
    pad_s = (p0 - S % p0) % p0
    if pad_w or pad_h or pad_s:
        x = jnp.pad(x, ((0, 0), (0, 0), (0, pad_s), (0, pad_h), (0, pad_w)))
    y = jax.lax.conv_general_dilated(
        x, params["proj_w"], window_strides=patch_size, padding="VALID",
        dimension_numbers=("NCDHW", "OIDHW", "NCDHW"),
        precision=jax.lax.Precision.HIGHEST)
    y = y + params["proj_b"][None, :, None, None, None]
    if use_norm:
        Bb, E, Ws, Wh, Ww = y.shape
        t = jnp.transpose(y.reshape(Bb, E, -1), (0, 2, 1))      # (B, L, E)
        mean = t.mean(-1, keepdims=True)
        var = ((t - mean) ** 2).mean(-1, keepdims=True)
        t = (t - mean) / jnp.sqrt(var + eps)
        t = t * params["norm_g"] + params["norm_b"]
        y = jnp.transpose(t, (0, 2, 1)).reshape(Bb, E, Ws, Wh, Ww)
    return y


# ----------------------------------------------------------------------------
# Main
# ----------------------------------------------------------------------------
if __name__ == "__main__":
    patch_size = (4, 4, 4)
    in_chans = 1
    embed_dim = 96
    B, S, H, W = 2, 14, 18, 18            # exercises the end-padding path

    key = jax.random.PRNGKey(0)
    k_x, k_w, k_b, k_g, k_n = jax.random.split(key, 5)

    x = jax.random.normal(k_x, (B, in_chans, S, H, W), dtype=jnp.float32)
    params = {
        # Conv3d weight layout: (embed_dim, in_chans, p0, p1, p2)
        "proj_w": 0.05 * jax.random.normal(
            k_w, (embed_dim, in_chans, *patch_size), dtype=jnp.float32),
        "proj_b": 0.01 * jax.random.normal(k_b, (embed_dim,),
                                           dtype=jnp.float32),
        # LayerNorm affine params
        "norm_g": 1.0 + 0.1 * jax.random.normal(k_g, (embed_dim,),
                                                dtype=jnp.float32),
        "norm_b": 0.01 * jax.random.normal(k_n, (embed_dim,),
                                           dtype=jnp.float32),
    }

    Sp = S + (patch_size[0] - S % patch_size[0]) % patch_size[0]
    Hp = H + (patch_size[1] - H % patch_size[1]) % patch_size[1]
    Wp = W + (patch_size[2] - W % patch_size[2]) % patch_size[2]
    expected_shape = (B, embed_dim, Sp // patch_size[0],
                      Hp // patch_size[1], Wp // patch_size[2])

    # Check both module branches: norm_layer=LayerNorm and norm_layer=None.
    for use_norm in (True, False):
        fwd = jax.jit(functools.partial(
            patch_embed_forward, patch_size=patch_size,
            embed_dim=embed_dim, use_norm=use_norm))
        out = jax.block_until_ready(fwd(x, params))

        assert out.shape == expected_shape, (out.shape, expected_shape)
        assert bool(jnp.all(jnp.isfinite(out)))

        ref = patch_embed_reference(x, params, patch_size=patch_size,
                                    embed_dim=embed_dim, use_norm=use_norm)
        assert bool(jnp.allclose(out, ref, atol=1e-3, rtol=1e-3)), (
            use_norm, float(jnp.max(jnp.abs(out - ref))))

    print("KERNEL_OK")
</pallas_src>

<mosaic_0001>
module attributes {stable_mosaic.version = 11 : i64} {
  func.func @_patch_embed_kernel(%arg0: i32, %arg1: memref<128x64xf32, #tpu.memory_space<vmem>>, %arg2: memref<64x96xf32, #tpu.memory_space<vmem>>, %arg3: memref<1x96xf32, #tpu.memory_space<vmem>>, %arg4: memref<1x96xf32, #tpu.memory_space<vmem>>, %arg5: memref<1x96xf32, #tpu.memory_space<vmem>>, %arg6: memref<128x96xf32, #tpu.memory_space<vmem>>) attributes {dimension_semantics = [#tpu.dimension_semantics<parallel>], iteration_bounds = array<i64: 2>, scalar_prefetch = 0 : i64, scratch_operands = 0 : i64, tpu.core_type = #tpu.core_type<tc>, window_params = [{transform_indices = @transform_0, window_bounds = array<i64: 128, 64>}, {pipeline_mode = #tpu.pipeline_mode<synchronous>, transform_indices = @transform_1, window_bounds = array<i64: 64, 96>}, {pipeline_mode = #tpu.pipeline_mode<synchronous>, transform_indices = @transform_2, window_bounds = array<i64: 1, 96>}, {pipeline_mode = #tpu.pipeline_mode<synchronous>, transform_indices = @transform_3, window_bounds = array<i64: 1, 96>}, {pipeline_mode = #tpu.pipeline_mode<synchronous>, transform_indices = @transform_4, window_bounds = array<i64: 1, 96>}, {transform_indices = @transform_5, window_bounds = array<i64: 128, 96>}]} {
    %c0 = arith.constant 0 : index
    %c0_0 = arith.constant 0 : index
    %0 = vector.load %arg1[%c0, %c0_0] : memref<128x64xf32, #tpu.memory_space<vmem>>, vector<128x64xf32>
    %c0_1 = arith.constant 0 : index
    %c0_2 = arith.constant 0 : index
    %1 = vector.load %arg2[%c0_1, %c0_2] : memref<64x96xf32, #tpu.memory_space<vmem>>, vector<64x96xf32>
    %cst = arith.constant dense<0.000000e+00> : vector<128x96xf32>
    %2 = tpu.matmul %0, %1, %cst {dimension_numbers = #tpu.dot_dimension_numbers<[1], [0], [0], [1], [0, 0, 1, 1], [], []>} : vector<128x64xf32>, vector<64x96xf32>, vector<128x96xf32> -> vector<128x96xf32>
    %c0_3 = arith.constant 0 : index
    %c0_4 = arith.constant 0 : index
    %3 = vector.load %arg3[%c0_3, %c0_4] : memref<1x96xf32, #tpu.memory_space<vmem>>, vector<1x96xf32>
    %4 = vector.broadcast %3 : vector<1x96xf32> to vector<128x96xf32>
    %5 = arith.addf %2, %4 : vector<128x96xf32>
    %cst_5 = arith.constant dense<0.000000e+00> : vector<128xf32>
    %6 = vector.multi_reduction <add>, %5, %cst_5 [1] : vector<128x96xf32> to vector<128xf32>
    %7 = vector.shape_cast %6 : vector<128xf32> to vector<128x1xf32>
    %cst_6 = arith.constant 9.600000e+01 : f32
    %8 = vector.broadcast %cst_6 : f32 to vector<128x1xf32>
    %9 = arith.divf %7, %8 : vector<128x1xf32>
    %10 = vector.broadcast %9 : vector<128x1xf32> to vector<128x96xf32>
    %11 = arith.subf %5, %10 : vector<128x96xf32>
    %12 = arith.mulf %11, %11 : vector<128x96xf32>
    %cst_7 = arith.constant dense<0.000000e+00> : vector<128xf32>
    %13 = vector.multi_reduction <add>, %12, %cst_7 [1] : vector<128x96xf32> to vector<128xf32>
    %14 = vector.shape_cast %13 : vector<128xf32> to vector<128x1xf32>
    %cst_8 = arith.constant 9.600000e+01 : f32
    %15 = vector.broadcast %cst_8 : f32 to vector<128x1xf32>
    %16 = arith.divf %14, %15 : vector<128x1xf32>
    %cst_9 = arith.constant 9.99999974E-6 : f32
    %17 = vector.broadcast %cst_9 : f32 to vector<128x1xf32>
    %18 = arith.addf %16, %17 : vector<128x1xf32>
    %19 = math.rsqrt %18 : vector<128x1xf32>
    %20 = vector.broadcast %19 : vector<128x1xf32> to vector<128x96xf32>
    %21 = arith.mulf %11, %20 : vector<128x96xf32>
    %c0_10 = arith.constant 0 : index
    %c0_11 = arith.constant 0 : index
    %22 = vector.load %arg4[%c0_10, %c0_11] : memref<1x96xf32, #tpu.memory_space<vmem>>, vector<1x96xf32>
    %23 = vector.broadcast %22 : vector<1x96xf32> to vector<128x96xf32>
    %24 = arith.mulf %21, %23 : vector<128x96xf32>
    %c0_12 = arith.constant 0 : index
    %c0_13 = arith.constant 0 : index
    %25 = vector.load %arg5[%c0_12, %c0_13] : memref<1x96xf32, #tpu.memory_space<vmem>>, vector<1x96xf32>
    %26 = vector.broadcast %25 : vector<1x96xf32> to vector<128x96xf32>
    %27 = arith.addf %24, %26 : vector<128x96xf32>
    %c0_14 = arith.constant 0 : index
    %c0_15 = arith.constant 0 : index
    %28 = vector.load %arg6[%c0_14, %c0_15] : memref<128x96xf32, #tpu.memory_space<vmem>>, vector<128x96xf32>
    tpu.vector_store %arg6[%c0_14, %c0_15], %27 {strides = array<i32>} : memref<128x96xf32, #tpu.memory_space<vmem>>, vector<128x96xf32>,
    return
  }
  func.func @transform_0(%arg0: i32) -> (i32, i32) {
    %c0_i32 = arith.constant 0 : i32
    %c0_i32_0 = arith.constant 0 : i32
    return %arg0, %c0_i32 : i32, i32
  }
  func.func @transform_1(%arg0: i32) -> (i32, i32) {
    %c0_i32 = arith.constant 0 : i32
    %c0_i32_0 = arith.constant 0 : i32
    %c0_i32_1 = arith.constant 0 : i32
    return %c0_i32, %c0_i32_0 : i32, i32
  }
  func.func @transform_2(%arg0: i32) -> (i32, i32) {
    %c0_i32 = arith.constant 0 : i32
    %c0_i32_0 = arith.constant 0 : i32
    %c0_i32_1 = arith.constant 0 : i32
    return %c0_i32, %c0_i32_0 : i32, i32
  }
  func.func @transform_3(%arg0: i32) -> (i32, i32) {
    %c0_i32 = arith.constant 0 : i32
    %c0_i32_0 = arith.constant 0 : i32
    %c0_i32_1 = arith.constant 0 : i32
    return %c0_i32, %c0_i32_0 : i32, i32
  }
  func.func @transform_4(%arg0: i32) -> (i32, i32) {
    %c0_i32 = arith.constant 0 : i32
    %c0_i32_0 = arith.constant 0 : i32
    %c0_i32_1 = arith.constant 0 : i32
    return %c0_i32, %c0_i32_0 : i32, i32
  }
  func.func @transform_5(%arg0: i32) -> (i32, i32) {
    %c0_i32 = arith.constant 0 : i32
    %c0_i32_0 = arith.constant 0 : i32
    return %arg0, %c0_i32 : i32, i32
  }
}

</mosaic_0001>

<bundles_post_ra>
// kernel: patch_embed_forward.1
= control target key start
LH: loop header
LB: loop body
LE: loop exit
PB: predicated region body
PF: predicated region fallthrough
CT: control target
= control target key end

     0   :  { %s977_s18 = smov 0   ;;  %s1310_s0 = inlined_call_operand.vmem [shape: f32[256,64], index: 0, kind: input, shape index: {}]   ;;  %s1311_s1 = inlined_call_operand.vmem [shape: f32[64,96], index: 1, kind: input, shape index: {}]   ;;  %s1312_s2 = inlined_call_operand.vmem [shape: f32[1,96], index: 2, kind: input, shape index: {}]   ;;  %s1313_s3 = inlined_call_operand.vmem [shape: f32[1,96], index: 3, kind: input, shape index: {}]   ;;  %s1314_s4 = inlined_call_operand.vmem [shape: f32[1,96], index: 4, kind: input, shape index: {}]   ;;  %s1315_s5 = inlined_call_operand.vmem [shape: f32[256,96], index: 5, kind: output, shape index: {}]  }
   0x1 LB: > { %s781_s19 = sadd.s32 4294967295, %s945_s18   ;;  %p785_p0 = scmp.ge.s32.totalorder %s945_s18, 1  ;;  %s945_s18 = sphi %s977_s18, %s15_s18  }
   0x2   : > { %p188_p1 = scmp.lt.s32.totalorder %s945_s18, 3 }
   0x4   : > { %p189_p2 = pnand %p785_p0, %p188_p1 }
   0x5   : > { %v244_v0 = vld [vmem:[%s1311_s1] sm:$0xff] (!%p189_p2)  ;;  %v245_v1 = vld [vmem:[%s1311_s1 + $0x8] sm:$0xff] (!%p189_p2)  ;;  %v246_v2 = vld [vmem:[%s1311_s1 + $0x10] sm:$0xff] (!%p189_p2)  ;;  %s786_s26 = sshll.u32 (!%p189_p2), %s781_s19, 4  ;;  %vm259_vm0 = vcmask (!%p189_p2), 523264   ;;  %vm453_vm1 = vcmask (!%p189_p2), 785408  }
   0x6   : > { %192 = sbr.rel (%p189_p2) target bundleno = 585 (0x249), region = 40  ;;  %v875_v3 = vpack.c.bf16 (!%p189_p2), %v245_v1, %v244_v0  ;;  %v247_v4 = vld [vmem:[%s1311_s1 + $0x18] sm:$0xff] (!%p189_p2)  ;;  %p217_p3 = scmp.lt.s32.totalorder (!%p189_p2), %s786_s26, 31  ;;  %v248_v6 = vld [vmem:[%s1311_s1 + $0x20] sm:$0xff] (!%p189_p2)  ;;  %v249_v7 = vld [vmem:[%s1311_s1 + $0x28] sm:$0xff] (!%p189_p2) }
   0x7   : > { %v879_v5 = vpack.c.bf16 (!%p189_p2), %v247_v4, %v246_v2  ;;  %v883_v8 = vpack.c.bf16 (!%p189_p2), %v249_v7, %v248_v6  ;;  %v250_v9 = vld [vmem:[%s1311_s1 + $0x30] sm:$0xff] (!%p189_p2)  ;;  %v251_v10 = vld [vmem:[%s1311_s1 + $0x38] sm:$0xff] (!%p189_p2)  ;;  %v790_v28 = vld [vmem:[%s1312_s2] ss:$0 sm:$0xff] (!%p189_p2) }
   0x8   : > { %876 = vmatprep.subr.bf16.mxu0 (!%p189_p2), %v875_v3  ;;  %891 = vmatprep.subr.bf16.mxu1 (!%p189_p2), %v875_v3  ;;  %v887_v13 = vpack.c.bf16 (!%p189_p2), %v251_v10, %v250_v9 }
   0x9   : > { %878 = vmatpush3.bf16.msra.mxu0 (!%p189_p2), %v875_v3  ;;  %895 = vmatpush3.bf16.msra.mxu1 (!%p189_p2), %v875_v3 }
   0xa   : > { %880 = vmatprep.subr.bf16.mxu0 (!%p189_p2), %v879_v5  ;;  %892 = vmatprep.subr.bf16.mxu1 (!%p189_p2), %v879_v5 }
   0xd   : > { %s1317_s26 = smov (!%p217_p3, %s786_s26), 31  ;;  %882 = vmatpush3.bf16.msra.mxu0 %v879_v5  ;;  %896 = vmatpush3.bf16.msra.mxu1 %v879_v5 }
   0xe   : > { %s787_s8 = sshll.u32 %s1317_s26, 3  ;;  %884 = vmatprep.subr.bf16.mxu0 %v883_v8  ;;  %893 = vmatprep.subr.bf16.mxu1 %v883_v8 }
   0xf   : > { %s1017_s15 = scalar_lea.vmem %s1310_s0, %s787_s8  ;;  %s1227_s25 = scalar_lea.vmem %s1315_s5, %s787_s8 }
  0x10   : > { %v228_v11 = vld [vmem:[%s1017_s15] sm:$0xff]  ;;  %v229_v14 = vld [vmem:[%s1017_s15 + $0x8] sm:$0xff]  ;;  %v230_v16 = vld [vmem:[%s1017_s15 + $0x10] sm:$0xff] }
  0x11   : > { %v236_v12 = vld [vmem:[%s1017_s15 + $0x40] sm:$0xff]  ;;  %851 = vmatprep.mubr.msk.f32.mxu0 %vm259_vm0, %v228_v11  ;;  %886 = vmatpush3.bf16.msra.mxu0 %v883_v8  ;;  %v237_v15 = vld [vmem:[%s1017_s15 + $0x48] sm:$0xff]  ;;  %v238_v17 = vld [vmem:[%s1017_s15 + $0x50] sm:$0xff] }
  0x12   : > { %863 = vmatprep.mubr.msk.f32.mxu1 %vm259_vm0, %v236_v12  ;;  %897 = vmatpush3.bf16.msra.mxu1 %v883_v8  ;;  %v231_v18 = vld [vmem:[%s1017_s15 + $0x18] sm:$0xff]  ;;  %v232_v20 = vld [vmem:[%s1017_s15 + $0x20] sm:$0xff]  ;;  %v233_v22 = vld [vmem:[%s1017_s15 + $0x28] sm:$0xff] }
  0x13   : > { %888 = vmatprep.subr.bf16.mxu0 %v887_v13  ;;  %894 = vmatprep.subr.bf16.mxu1 %v887_v13  ;;  %v239_v19 = vld [vmem:[%s1017_s15 + $0x58] sm:$0xff]  ;;  %v240_v21 = vld [vmem:[%s1017_s15 + $0x60] sm:$0xff]  ;;  %v241_v23 = vld [vmem:[%s1017_s15 + $0x68] sm:$0xff] }
  0x14   : > { %v234_v24 = vld [vmem:[%s1017_s15 + $0x30] sm:$0xff]  ;;  %v235_v26 = vld [vmem:[%s1017_s15 + $0x38] sm:$0xff] }
  0x15   : > { %890 = vmatpush3.bf16.msra.mxu0 %v887_v13  ;;  %v242_v25 = vld [vmem:[%s1017_s15 + $0x70] sm:$0xff]  ;;  %v243_v27 = vld [vmem:[%s1017_s15 + $0x78] sm:$0xff] }
  0x16   : > { %898 = vmatpush3.bf16.msra.mxu1 %v887_v13 }
  0x18   : > { %852 = vmatmul.mubr.msk.f32.vlgmr.msra.gmra.mrb[0].mxu0 %vm259_vm0, %v229_v14 }
  0x19   : > { %864 = vmatmul.mubr.msk.f32.vlgmr.msra.gmra.mrb[0].mxu1 %vm259_vm0, %v237_v15  ;;  %854 = vmatprep.mubr.msk.f32.mxu0 %vm259_vm0, %v230_v16 }
  0x1a   : > { %866 = vmatprep.mubr.msk.f32.mxu1 %vm259_vm0, %v238_v17 }
  0x1c   : > { %855 = vmatmul.mubr.msk.f32.gmra.mrb[2].mxu0 %vm259_vm0, %v231_v18 }
  0x1d   : > { %867 = vmatmul.mubr.msk.f32.gmra.mrb[2].mxu1 %vm259_vm0, %v239_v19  ;;  %857 = vmatprep.mubr.msk.f32.mxu0 %vm259_vm0, %v232_v20 }
  0x1e   : > { %869 = vmatprep.mubr.msk.f32.mxu1 %vm259_vm0, %v240_v21 }
  0x20   : > { %858 = vmatmul.mubr.msk.f32.gmra.mrb[4].mxu0 %vm259_vm0, %v233_v22 }
  0x21   : > { %870 = vmatmul.mubr.msk.f32.gmra.mrb[4].mxu1 %vm259_vm0, %v241_v23  ;;  %860 = vmatprep.mubr.msk.f32.mxu0 %vm259_vm0, %v234_v24 }
  0x22   : > { %872 = vmatprep.mubr.msk.f32.mxu1 %vm259_vm0, %v242_v25 }
  0x24   : > { %861 = vmatmul.mubr.msk.f32.gmra.mrb[6].mxu0 %vm259_vm0, %v235_v26 }
  0x25   : > { %873 = vmatmul.mubr.msk.f32.gmra.mrb[6].mxu1 %vm259_vm0, %v243_v27 }
  0xeb   : > { %v853_v29 = vpop.f32.mrb[0].mxu0 }
  0xec   : > { %v865_v30 = vpop.f32.mrb[0].mxu1  ;;  %v1054_v31 = vadd.f32 %v853_v29, %v790_v28  ;;  %v374_v33 = vpop.f32.mrb[1].mxu0 }
  0xed   : > { %v1056_v32 = vadd.f32 %v865_v30, %v790_v28  ;;  %v414_v34 = vpop.f32.mrb[1].mxu1  ;;  %v1058_v35 = vadd.f32 %v790_v28, %v374_v33 }
  0xee   : > { %v457_v37 = vsel %vm453_vm1, %v1054_v31, 0.0  ;;  %v1066_v44 = vadd.f32 %v790_v28, %v414_v34 }
  0xef   : > { %v481_v36 = vsel %vm453_vm1, %v1056_v32, 0.0  ;;  %458 = vadd.xlane.f32.xlu0 %v457_v37  ;;  %v856_v38 = vpop.f32.mrb[2].mxu0  ;;  %v454_v46 = vsel %vm453_vm1, %v1058_v35, 0.0 }
  0xf0   : > { %482 = vadd.xlane.f32.xlu1 %v481_v36  ;;  %v868_v39 = vpop.f32.mrb[2].mxu1  ;;  %v390_v40 = vadd.f32 %v856_v38, %v790_v28  ;;  %v384_v41 = vpop.f32.mrb[3].mxu0  ;;  %v478_v54 = vsel %vm453_vm1, %v1066_v44, 0.0 }
  0xf1   : > { %v1064_v42 = vadd.f32 %v868_v39, %v790_v28  ;;  %v424_v43 = vpop.f32.mrb[3].mxu1  ;;  %v1073_v52 = vadd.f32 %v790_v28, %v384_v41 }
  0xf2   : > { %v463_v45 = vsel %vm453_vm1, %v390_v40, 0.0  ;;  %v1075_v53 = vadd.f32 %v790_v28, %v424_v43 }
  0xf3   : > { %455 = vadd.xlane.f32.xlu0 %v454_v46  ;;  %v859_v47 = vpop.f32.mrb[4].mxu0  ;;  %v487_v49 = vsel %vm453_vm1, %v1064_v42, 0.0  ;;  %v460_v61 = vsel %vm453_vm1, %v1073_v52, 0.0 }
  0xf4   : > { %464 = vadd.xlane.f32.xlu1 %v463_v45  ;;  %v871_v48 = vpop.f32.mrb[4].mxu1  ;;  %v394_v50 = vpop.f32.mrb[5].mxu0  ;;  %v1079_v57 = vadd.f32 %v859_v47, %v790_v28  ;;  %v484_v62 = vsel %vm453_vm1, %v1075_v53, 0.0 }
  0xf5   : > { %v434_v51 = vpop.f32.mrb[5].mxu1  ;;  %v1081_v58 = vadd.f32 %v790_v28, %v394_v50  ;;  %v1087_v63 = vadd.f32 %v871_v48, %v790_v28 }
  0xf6   : > { %v1089_v0 = vadd.f32 %v790_v28, %v434_v51  ;;  %v469_v1 = vsel %vm453_vm1, %v1079_v57, 0.0 }
  0xf7   : > { %479 = vadd.xlane.f32.xlu0 %v478_v54  ;;  %v862_v55 = vpop.f32.mrb[6].mxu0  ;;  %v466_v2 = vsel %vm453_vm1, %v1081_v58, 0.0  ;;  %v493_v5 = vsel %vm453_vm1, %v1087_v63, 0.0 }
  0xf8   : > { %488 = vadd.xlane.f32.xlu1 %v487_v49  ;;  %v874_v56 = vpop.f32.mrb[6].mxu1  ;;  %v404_v59 = vpop.f32.mrb[7].mxu0  ;;  %v1095_v3 = vadd.f32 %v862_v55, %v790_v28  ;;  %v490_v6 = vsel %vm453_vm1, %v1089_v0, 0.0 }
  0xf9   : > { %v444_v60 = vpop.f32.mrb[7].mxu1  ;;  %v1097_v4 = vadd.f32 %v790_v28, %v404_v59  ;;  %v1103_v7 = vadd.f32 %v874_v56, %v790_v28 }
  0xfa   : > { %v1105_v8 = vadd.f32 %v790_v28, %v444_v60  ;;  %v475_v9 = vsel %vm453_vm1, %v1095_v3, 0.0 }
  0xfb   : > { %485 = vadd.xlane.f32.xlu0 %v484_v62  ;;  %v472_v10 = vsel %vm453_vm1, %v1097_v4, 0.0  ;;  %v499_v11 = vsel %vm453_vm1, %v1103_v7, 0.0 }
  0xfc   : > { %461 = vadd.xlane.f32.xlu1 %v460_v61  ;;  %v496_v12 = vsel %vm453_vm1, %v1105_v8, 0.0 }
  0xff   : > { %467 = vadd.xlane.f32.xlu0 %v466_v2 }
 0x100   : > { %470 = vadd.xlane.f32.xlu1 %v469_v1 }
 0x103   : > { %491 = vadd.xlane.f32.xlu0 %v490_v6 }
 0x104   : > { %494 = vadd.xlane.f32.xlu1 %v493_v5 }
 0x107   : > { %473 = vadd.xlane.f32.xlu0 %v472_v10 }
 0x108   : > { %476 = vadd.xlane.f32.xlu1 %v475_v9 }
 0x10b   : > { %497 = vadd.xlane.f32.xlu0 %v496_v12 }
 0x10c   : > { %500 = vadd.xlane.f32.xlu1 %v499_v11 }
 0x17c   : > { %v459_v14 = vpop.xlane.xlu0 %458 }
 0x17d   : > { %v483_v13 = vpop.xlane.xlu1 %482  ;;  %v504_v16 = vmul.f32 0.010416667, %v459_v14 }
 0x17e   : > { %v512_v15 = vmul.f32 0.010416667, %v483_v13 }
 0x17f   : > { %v1119_v18 = vsub.f32 %v1054_v31, %v504_v16 }
 0x180   : > { %v1116_v17 = vsub.f32 %v1056_v32, %v512_v15  ;;  %v456_v20 = vpop.xlane.xlu0 %455 }
 0x181   : > { %v465_v19 = vpop.xlane.xlu1 %464  ;;  %v503_v22 = vmul.f32 0.010416667, %v456_v20  ;;  %v536_v23 = vmul.f32 %v1119_v18, %v1119_v18 }
 0x182   : > { %v506_v21 = vmul.f32 0.010416667, %v465_v19  ;;  %v544_v27 = vmul.f32 %v1116_v17, %v1116_v17 }
 0x183   : > { %v1126_v25 = vsub.f32 %v1058_v35, %v503_v22  ;;  %v554_v26 = vsel %vm453_vm1, %v536_v23, 0.0 }
 0x184   : > { %v1123_v24 = vsub.f32 %v390_v40, %v506_v21  ;;  %555 = vadd.xlane.f32.xlu1 %v554_v26  ;;  %v480_v29 = vpop.xlane.xlu0 %479  ;;  %v578_v36 = vsel %vm453_vm1, %v544_v27, 0.0 }
 0x185   : > { %v489_v28 = vpop.xlane.xlu1 %488  ;;  %v511_v31 = vmul.f32 0.010416667, %v480_v29  ;;  %v535_v32 = vmul.f32 %v1126_v25, %v1126_v25 }
 0x186   : > { %v514_v30 = vmul.f32 0.010416667, %v489_v28  ;;  %v538_v33 = vmul.f32 %v1123_v24, %v1123_v24 }
 0x187   : > { %v1139_v35 = vsub.f32 %v1066_v44, %v511_v31  ;;  %v551_v37 = vsel %vm453_vm1, %v535_v32, 0.0 }
 0x188   : > { %v1136_v34 = vsub.f32 %v1064_v42, %v514_v30  ;;  %579 = vadd.xlane.f32.xlu1 %v578_v36  ;;  %552 = vadd.xlane.f32.xlu0 %v551_v37  ;;  %v486_v39 = vpop.xlane.xlu0 %485  ;;  %v560_v45 = vsel %vm453_vm1, %v538_v33, 0.0 }
 0x189   : > { %v462_v38 = vpop.xlane.xlu1 %461  ;;  %v513_v41 = vmul.f32 0.010416667, %v486_v39  ;;  %v543_v43 = vmul.f32 %v1139_v35, %v1139_v35 }
 0x18a   : > { %v505_v40 = vmul.f32 0.010416667, %v462_v38  ;;  %v546_v47 = vmul.f32 %v1136_v34, %v1136_v34 }
 0x18b   : > { %v1150_v44 = vsub.f32 %v1075_v53, %v513_v41  ;;  %v575_v46 = vsel %vm453_vm1, %v543_v43, 0.0 }
 0x18c   : > { %v1147_v42 = vsub.f32 %v1073_v52, %v505_v40  ;;  %561 = vadd.xlane.f32.xlu1 %v560_v45  ;;  %576 = vadd.xlane.f32.xlu0 %v575_v46  ;;  %v468_v49 = vpop.xlane.xlu0 %467  ;;  %v584_v56 = vsel %vm453_vm1, %v546_v47, 0.0 }
 0x18d   : > { %v471_v48 = vpop.xlane.xlu1 %470  ;;  %v507_v51 = vmul.f32 0.010416667, %v468_v49  ;;  %v545_v52 = vmul.f32 %v1150_v44, %v1150_v44 }
 0x18e   : > { %v508_v50 = vmul.f32 0.010416667, %v471_v48  ;;  %v537_v54 = vmul.f32 %v1147_v42, %v1147_v42 }
 0x18f   : > { %v1163_v55 = vsub.f32 %v1081_v58, %v507_v51  ;;  %v581_v5 = vsel %vm453_vm1, %v545_v52, 0.0 }
 0x190   : > { %v1160_v53 = vsub.f32 %v1079_v57, %v508_v50  ;;  %v557_v59 = vsel %vm453_vm1, %v537_v54, 0.0  ;;  %585 = vadd.xlane.f32.xlu1 %v584_v56  ;;  %v492_v61 = vpop.xlane.xlu0 %491 }
 0x191   : > { %v495_v60 = vpop.xlane.xlu1 %494  ;;  %558 = vadd.xlane.f32.xlu0 %v557_v59  ;;  %v515_v1 = vmul.f32 0.010416667, %v492_v61  ;;  %v539_v9 = vmul.f32 %v1163_v55, %v1163_v55  ;;  %v1213_v61 = vld [vmem:[%s1313_s3] ss:$0 sm:$0xff] }
 0x192   : > { %v516_v62 = vmul.f32 0.010416667, %v495_v60  ;;  %v540_v2 = vmul.f32 %v1160_v53, %v1160_v53 }
 0x193   : > { %v1174_v58 = vsub.f32 %v1089_v0, %v515_v1  ;;  %v563_v19 = vsel %vm453_vm1, %v539_v9, 0.0  ;;  %v1219_v9 = vld [vmem:[%s1314_s4] ss:$0 sm:$0xff] }
 0x194   : > { %v1171_v57 = vsub.f32 %v1087_v63, %v516_v62  ;;  %v566_v6 = vsel %vm453_vm1, %v540_v2, 0.0  ;;  %v474_v11 = vpop.xlane.xlu0 %473 }
 0x195   : > { %567 = vadd.xlane.f32.xlu1 %v566_v6  ;;  %v477_v10 = vpop.xlane.xlu1 %476  ;;  %582 = vadd.xlane.f32.xlu0 %v581_v5  ;;  %v509_v13 = vmul.f32 0.010416667, %v474_v11  ;;  %v547_v63 = vmul.f32 %v1174_v58, %v1174_v58 }
 0x196   : > { %v510_v12 = vmul.f32 0.010416667, %v477_v10  ;;  %v548_v14 = vmul.f32 %v1171_v57, %v1171_v57 }
 0x197   : > { %v1187_v15 = vsub.f32 %v1097_v4, %v509_v13  ;;  %v587_v27 = vsel %vm453_vm1, %v547_v63, 0.0 }
 0x198   : > { %v1184_v0 = vsub.f32 %v1095_v3, %v510_v12  ;;  %v590_v16 = vsel %vm453_vm1, %v548_v14, 0.0  ;;  %v498_v21 = vpop.xlane.xlu0 %497 }
 0x199   : > { %591 = vadd.xlane.f32.xlu1 %v590_v16  ;;  %v501_v20 = vpop.xlane.xlu1 %500  ;;  %564 = vadd.xlane.f32.xlu0 %v563_v19  ;;  %v517_v23 = vmul.f32 0.010416667, %v498_v21  ;;  %v541_v29 = vmul.f32 %v1187_v15, %v1187_v15 }
 0x19a   : > { %v518_v22 = vmul.f32 0.010416667, %v501_v20  ;;  %v542_v26 = vmul.f32 %v1184_v0, %v1184_v0 }
 0x19b   : > { %v1198_v4 = vsub.f32 %v1105_v8, %v517_v23  ;;  %v569_v32 = vsel %vm453_vm1, %v541_v29, 0.0 }
 0x19c   : > { %v1195_v3 = vsub.f32 %v1103_v7, %v518_v22  ;;  %v572_v28 = vsel %vm453_vm1, %v542_v26, 0.0 }
 0x19d   : > { %573 = vadd.xlane.f32.xlu1 %v572_v28  ;;  %588 = vadd.xlane.f32.xlu0 %v587_v27  ;;  %v549_v7 = vmul.f32 %v1198_v4, %v1198_v4 }
 0x19e   : > { %v550_v30 = vmul.f32 %v1195_v3, %v1195_v3 }
 0x19f   : > { %v593_v8 = vsel %vm453_vm1, %v549_v7, 0.0 }
 0x1a0   : > { %v596_v31 = vsel %vm453_vm1, %v550_v30, 0.0 }
 0x1a1   : > { %597 = vadd.xlane.f32.xlu1 %v596_v31  ;;  %570 = vadd.xlane.f32.xlu0 %v569_v32 }
 0x1a5   : > { %594 = vadd.xlane.f32.xlu0 %v593_v8 }
 0x211   : > { %v556_v33 = vpop.xlane.xlu1 %555 }
 0x212   : > { %v600_v36 = vmul.f32 0.010416667, %v556_v33 }
 0x214   : > { %v616_v37 = vadd.f32 1e-05, %v600_v36 }
 0x215   : > { %v580_v38 = vpop.xlane.xlu1 %579  ;;  %v553_v39 = vpop.xlane.xlu0 %552 }
 0x216   : > { %907 = vrsqrt.f32 %v616_v37  ;;  %v608_v40 = vmul.f32 0.010416667, %v580_v38  ;;  %v599_v41 = vmul.f32 0.010416667, %v553_v39 }
 0x218   : > { %v624_v43 = vadd.f32 1e-05, %v608_v40  ;;  %v615_v45 = vadd.f32 1e-05, %v599_v41 }
 0x219   : > { %v562_v46 = vpop.xlane.xlu1 %561  ;;  %v577_v47 = vpop.xlane.xlu0 %576 }
 0x21a   : > { %909 = vrsqrt.f32 %v624_v43  ;;  %v602_v48 = vmul.f32 0.010416667, %v562_v46  ;;  %v607_v49 = vmul.f32 0.010416667, %v577_v47 }
 0x21b   : > { %911 = vrsqrt.f32 %v615_v45 }
 0x21c   : > { %v618_v50 = vadd.f32 1e-05, %v602_v48  ;;  %v623_v51 = vadd.f32 1e-05, %v607_v49 }
 0x21d   : > { %v586_v54 = vpop.xlane.xlu1 %585 }
 0x21e   : > { %v559_v52 = vpop.xlane.xlu0 %558  ;;  %913 = vrsqrt.f32 %v618_v50  ;;  %v610_v56 = vmul.f32 0.010416667, %v586_v54 }
 0x21f   : > { %v601_v59 = vmul.f32 0.010416667, %v559_v52  ;;  %915 = vrsqrt.f32 %v623_v51 }
 0x220   : > { %v908_v60 = vpop.eup %907  ;;  %v626_v62 = vadd.f32 1e-05, %v610_v56 }
 0x221   : > { %v617_v1 = vadd.f32 1e-05, %v601_v59  ;;  %v648_v2 = vmul.f32 %v908_v60, %v1119_v18 }
 0x222   : > { %v568_v5 = vpop.xlane.xlu1 %567  ;;  %v583_v6 = vpop.xlane.xlu0 %582  ;;  %917 = vrsqrt.f32 %v626_v62 }
 0x223   : > { %v604_v10 = vmul.f32 0.010416667, %v568_v5  ;;  %v609_v11 = vmul.f32 0.010416667, %v583_v6  ;;  %v671_v12 = vmul.f32 %v1213_v61, %v648_v2  ;;  %919 = vrsqrt.f32 %v617_v1 }
 0x224   : > { %v910_v13 = vpop.eup %909 }
 0x225   : > { %v620_v18 = vadd.f32 1e-05, %v604_v10  ;;  %v625_v14 = vadd.f32 1e-05, %v609_v11  ;;  %v912_v63 = vpop.eup %911  ;;  %v694_v16 = vadd.f32 %v1219_v9, %v671_v12  ;;  %v656_v19 = vmul.f32 %v910_v13, %v1116_v17 }
 0x226   : > { %v592_v20 = vpop.xlane.xlu1 %591  ;;  %v565_v21 = vpop.xlane.xlu0 %564  ;;  %v647_v22 = vmul.f32 %v912_v63, %v1126_v25 }
 0x227   : > { %921 = vrsqrt.f32 %v620_v18  ;;  %v612_v23 = vmul.f32 0.010416667, %v592_v20  ;;  %v603_v26 = vmul.f32 0.010416667, %v565_v21  ;;  %710 = vst.msk [vmem:[%s1227_s25 + $0x8] sm:$0xff] %vm453_vm1, %v694_v16  ;;  %v679_v27 = vmul.f32 %v1213_v61, %v656_v19 }
 0x228   : > { %923 = vrsqrt.f32 %v625_v14  ;;  %v914_v28 = vpop.eup %913  ;;  %v670_v29 = vmul.f32 %v1213_v61, %v647_v22 }
 0x229   : > { %v628_v30 = vadd.f32 1e-05, %v612_v23  ;;  %v619_v31 = vadd.f32 1e-05, %v603_v26  ;;  %v916_v17 = vpop.eup %915  ;;  %v702_v32 = vadd.f32 %v1219_v9, %v679_v27  ;;  %v650_v25 = vmul.f32 %v914_v28, %v1123_v24 }
 0x22a   : > { %v574_v7 = vpop.xlane.xlu1 %573  ;;  %v589_v8 = vpop.xlane.xlu0 %588  ;;  %v693_v33 = vadd.f32 %v1219_v9, %v670_v29  ;;  %v655_v36 = vmul.f32 %v916_v17, %v1139_v35 }
 0x22b   : > { %925 = vrsqrt.f32 %v628_v30  ;;  %v606_v37 = vmul.f32 0.010416667, %v574_v7  ;;  %718 = vst.msk [vmem:[%s1227_s25 + $0x48] sm:$0xff] %vm453_vm1, %v702_v32  ;;  %v673_v38 = vmul.f32 %v1213_v61, %v650_v25  ;;  %v611_v39 = vmul.f32 0.010416667, %v589_v8 }
 0x22c   : > { %927 = vrsqrt.f32 %v619_v31  ;;  %v918_v40 = vpop.eup %917  ;;  %709 = vst.msk [vmem:[%s1227_s25] sm:$0xff] %vm453_vm1, %v693_v33  ;;  %v678_v24 = vmul.f32 %v1213_v61, %v655_v36 }
 0x22d   : > { %v622_v41 = vadd.f32 1e-05, %v606_v37  ;;  %v920_v43 = vpop.eup %919  ;;  %v696_v45 = vadd.f32 %v1219_v9, %v673_v38  ;;  %v658_v35 = vmul.f32 %v918_v40, %v1136_v34  ;;  %v627_v46 = vadd.f32 1e-05, %v611_v39 }
 0x22e   : > { %v598_v47 = vpop.xlane.xlu1 %597  ;;  %v571_v48 = vpop.xlane.xlu0 %570  ;;  %v701_v49 = vadd.f32 %v1219_v9, %v678_v24  ;;  %v649_v50 = vmul.f32 %v920_v43, %v1147_v42 }
 0x22f   : > { %929 = vrsqrt.f32 %v622_v41  ;;  %v614_v51 = vmul.f32 0.010416667, %v598_v47  ;;  %712 = vst.msk [vmem:[%s1227_s25 + $0x18] sm:$0xff] %vm453_vm1, %v696_v45  ;;  %v681_v54 = vmul.f32 %v1213_v61, %v658_v35  ;;  %v605_v52 = vmul.f32 0.010416667, %v571_v48 }
 0x230   : > { %931 = vrsqrt.f32 %v627_v46  ;;  %717 = vst.msk [vmem:[%s1227_s25 + $0x40] sm:$0xff] %vm453_vm1, %v701_v49  ;;  %v672_v34 = vmul.f32 %v1213_v61, %v649_v50 }
 0x231   : > { %v922_v56 = vpop.eup %921  ;;  %v630_v59 = vadd.f32 1e-05, %v614_v51  ;;  %v704_v62 = vadd.f32 %v1219_v9, %v681_v54  ;;  %v621_v1 = vadd.f32 1e-05, %v605_v52 }
 0x232   : > { %v924_v60 = vpop.eup %923  ;;  %v652_v42 = vmul.f32 %v922_v56, %v1160_v53  ;;  %v595_v2 = vpop.xlane.xlu0 %594  ;;  %v695_v5 = vadd.f32 %v1219_v9, %v672_v34 }
 0x233   : > { %v657_v6 = vmul.f32 %v924_v60, %v1150_v44  ;;  %933 = vrsqrt.f32 %v630_v59  ;;  %v613_v10 = vmul.f32 0.010416667, %v595_v2  ;;  %720 = vst.msk [vmem:[%s1227_s25 + $0x58] sm:$0xff] %vm453_vm1, %v704_v62 }
 0x234   : > { %v675_v11 = vmul.f32 %v1213_v61, %v652_v42  ;;  %935 = vrsqrt.f32 %v621_v1  ;;  %711 = vst.msk [vmem:[%s1227_s25 + $0x10] sm:$0xff] %vm453_vm1, %v695_v5 }
 0x235   : > { %v926_v12 = vpop.eup %925  ;;  %v680_v53 = vmul.f32 %v1213_v61, %v657_v6  ;;  %v629_v13 = vadd.f32 1e-05, %v613_v10 }
 0x236   : > { %v928_v18 = vpop.eup %927  ;;  %v698_v14 = vadd.f32 %v1219_v9, %v675_v11  ;;  %v660_v44 = vmul.f32 %v926_v12, %v1171_v57 }
 0x237   : > { %v703_v63 = vadd.f32 %v1219_v9, %v680_v53  ;;  %v651_v16 = vmul.f32 %v928_v18, %v1163_v55  ;;  %937 = vrsqrt.f32 %v629_v13 }
 0x238   : > { %714 = vst.msk [vmem:[%s1227_s25 + $0x28] sm:$0xff] %vm453_vm1, %v698_v14  ;;  %v683_v19 = vmul.f32 %v1213_v61, %v660_v44 }
 0x239   : > { %v930_v20 = vpop.eup %929  ;;  %719 = vst.msk [vmem:[%s1227_s25 + $0x50] sm:$0xff] %vm453_vm1, %v703_v63  ;;  %v674_v21 = vmul.f32 %v1213_v61, %v651_v16 }
 0x23a   : > { %v932_v22 = vpop.eup %931  ;;  %v706_v23 = vadd.f32 %v1219_v9, %v683_v19  ;;  %v654_v57 = vmul.f32 %v930_v20, %v1184_v0 }
 0x23b   : > { %v697_v26 = vadd.f32 %v1219_v9, %v674_v21  ;;  %v659_v55 = vmul.f32 %v932_v22, %v1174_v58 }
 0x23c   : > { %722 = vst.msk [vmem:[%s1227_s25 + $0x68] sm:$0xff] %vm453_vm1, %v706_v23  ;;  %v677_v27 = vmul.f32 %v1213_v61, %v654_v57 }
 0x23d   : > { %v934_v28 = vpop.eup %933  ;;  %713 = vst.msk [vmem:[%s1227_s25 + $0x20] sm:$0xff] %vm453_vm1, %v697_v26  ;;  %v682_v29 = vmul.f32 %v1213_v61, %v659_v55 }
 0x23e   : > { %v936_v30 = vpop.eup %935  ;;  %v700_v31 = vadd.f32 %v1219_v9, %v677_v27  ;;  %v662_v0 = vmul.f32 %v934_v28, %v1195_v3 }
 0x23f   : > { %v705_v17 = vadd.f32 %v1219_v9, %v682_v29  ;;  %v653_v58 = vmul.f32 %v936_v30, %v1187_v15 }
 0x240   : > { %716 = vst.msk [vmem:[%s1227_s25 + $0x38] sm:$0xff] %vm453_vm1, %v700_v31  ;;  %v685_v32 = vmul.f32 %v1213_v61, %v662_v0 }
 0x241   : > { %v938_v25 = vpop.eup %937  ;;  %721 = vst.msk [vmem:[%s1227_s25 + $0x60] sm:$0xff] %vm453_vm1, %v705_v17  ;;  %v676_v7 = vmul.f32 %v1213_v61, %v653_v58 }
 0x242   : > { %v708_v8 = vadd.f32 %v1219_v9, %v685_v32  ;;  %v661_v33 = vmul.f32 %v938_v25, %v1198_v4 }
 0x243   : > { %v699_v36 = vadd.f32 %v1219_v9, %v676_v7 }
 0x244   : > { %724 = vst.msk [vmem:[%s1227_s25 + $0x78] sm:$0xff] %vm453_vm1, %v708_v8  ;;  %v684_v3 = vmul.f32 %v1213_v61, %v661_v33 }
 0x245   : > { %715 = vst.msk [vmem:[%s1227_s25 + $0x30] sm:$0xff] %vm453_vm1, %v699_v36 }
 0x246   : > { %v707_v15 = vadd.f32 %v1219_v9, %v684_v3 }
 0x248   : > { %723 = vst.msk [vmem:[%s1227_s25 + $0x70] sm:$0xff] %vm453_vm1, %v707_v15 }
 0x249 PF: > { %s15_s18 = sadd.s32 1, %s945_s18  }
 0x24a   : > { %p12_p4 = scmp.ge.s32.totalorder %s15_s18, 4  }
 0x24c   :  { %14 = sbr.rel (!%p12_p4) target bundleno = 1 (0x1), region = 70 }

</bundles_post_ra>
